<compile_context>
chip_gen: v7x
topology: tpu7x:2x2x1
jax: 0.10.0
libtpu: 0.0.40
codegen_flags: <defaults>
</compile_context>

<pallas_src>
import dataclasses
import functools

import numpy as np

import jax
import jax.numpy as jnp
from jax.experimental import pallas as pl
from jax.experimental.pallas import tpu as pltpu


# ----------------------------- config ---------------------------------------


@dataclasses.dataclass
class Config:
    ma_win_len: int = 5
    time_embed_dim: int = 8
    num_step: int = 16          # input sequence length L
    num_pred_step: int = 8      # prediction horizon P
    embed_cluster: bool = False
    num_cluster: int = 4
    cluster_embed_dim: int = 3


_EPS = 1e-5
_LANE = 128
_MAX_TB = 4096        # packed rows / grid step (= _MAX_TB * G series); ~2 MiB in + 2 MiB out
_SPLIT_ROWS = 256     # above this many packed rows use >=2 grid steps (v7x megacore)


def _round_up(x: int, m: int) -> int:
    return ((x + m - 1) // m) * m


def _packing(config: Config):
    """Packing geometry: G series per row, (tick,value)-interleaved input lanes."""
    L, P = config.num_step, config.num_pred_step
    G = max(1, -(-_LANE // (2 * L)))       # input rows >= 128 lanes (lane dense)
    in_w = G * 2 * L                       # packed input row width
    out_w = G * (L + 2 * P)                # packed output row width
    aligned = (2 * L) == (L + 2 * P)       # group input/output lane regions coincide
    return G, in_w, out_w, aligned


# ----------------------------- Pallas kernel --------------------------------


def _tdlinear_kernel(*refs, aligned: bool):
    """Fused select -> normalize -> decompose+heads (one matmul) -> denorm.

    Refs (aligned case):
      x_ref  : [TB, IN_W]   raw packed rows, (tick,value) interleaved, G series/row
      mi_ref : [IN_W, IN_W] per-group mean matrix (rows only at value lanes, 1/L)
      w_ref  : [IN_W, OUT_W] block-diagonal folded head weights
      b_ref  : [1, OUT_W]   folded biases   [0 | bs | bs+bt] per group
      vm_ref : [1, IN_W]    value-lane mask (kills tick lanes)
      pm_ref : [1, OUT_W]   prediction-lane mask (lanes that get denormalized)
      out_ref: [TB, OUT_W]  [ mid_season | mid_season_pred | denormed pred ] per group
    Non-aligned case additionally gets mo_ref [IN_W, OUT_W] (mean matrix whose
    columns live on the OUTPUT lane layout).
    """
    if aligned:
        x_ref, mi_ref, w_ref, b_ref, vm_ref, pm_ref, out_ref = refs
    else:
        x_ref, mi_ref, mo_ref, w_ref, b_ref, vm_ref, pm_ref, out_ref = refs

    x = x_ref[...] * vm_ref[...]                       # zero tick lanes (1 VPU mul)

    # Per-series mean / variance via small constant matmuls (MXU is ~idle here).
    mean_i = jnp.dot(x, mi_ref[...], preferred_element_type=jnp.float32)
    cent = x - mean_i
    c2 = cent * cent
    var_i = jnp.dot(c2, mi_ref[...], preferred_element_type=jnp.float32)
    rstd_i = jax.lax.rsqrt(var_i + _EPS)               # EUP slot (otherwise idle)
    normed = cent * rstd_i

    # Trend extraction + seasonal & trend heads: ONE block-diagonal MXU matmul.
    y = jnp.dot(normed, w_ref[...], preferred_element_type=jnp.float32) + b_ref[...]

    # Per-series std / mean on the OUTPUT lane layout for the denorm.
    if aligned:                                        # input/output group lanes coincide
        mean_o, var_o, rstd_o = mean_i, var_i, rstd_i
    else:
        mean_o = jnp.dot(x, mo_ref[...], preferred_element_type=jnp.float32)
        var_o = jnp.dot(c2, mo_ref[...], preferred_element_type=jnp.float32)
        rstd_o = jax.lax.rsqrt(var_o + _EPS)
    std_o = (var_o + _EPS) * rstd_o                    # sqrt(var+eps) via 1 extra mul

    # Normalizer.restore only on the prediction lanes (precomputed constant mask;
    # no per-iteration iota/compare).
    pm = pm_ref[...]
    scale = (std_o - 1.0) * pm + 1.0                   # std at pred lanes, 1 elsewhere
    shift = mean_o * pm                                # mean at pred lanes, 0 elsewhere
    out_ref[...] = (y * scale + shift).astype(out_ref.dtype)


# ----------------------------- parameter prep -------------------------------


def _build_ma_matrix(L: int, win: int) -> np.ndarray:
    """[L, L] matrix A with (x @ A)[t] = replicate-padded centered moving average."""
    front = (win - 1) // 2
    A = np.zeros((L, L), dtype=np.float32)
    for t in range(L):
        for k in range(win):
            j = min(max(t + k - front, 0), L - 1)
            A[j, t] += 1.0 / win
    return A


def init_params(config: Config, key) -> dict:
    """nn.Linear-style init + one-time algebraic folding into packed constants."""
    L, P = config.num_step, config.num_pred_step
    k1, k2, k3, k4 = jax.random.split(key, 4)
    bound = 1.0 / np.sqrt(L)
    w_season = jax.random.uniform(k1, (L, P), jnp.float32, -bound, bound)
    b_season = jax.random.uniform(k2, (1, P), jnp.float32, -bound, bound)
    w_trend = jax.random.uniform(k3, (L, P), jnp.float32, -bound, bound)
    b_trend = jax.random.uniform(k4, (1, P), jnp.float32, -bound, bound)

    # TODO(synk): moving-average convention (centered, replicate padding) assumed;
    #             verify against the original SimpleMovingAverage.
    A = _build_ma_matrix(L, config.ma_win_len)                       # [L, L]
    season_proj = np.eye(L, dtype=np.float32) - A                    # season = normed @ (I-A)
    ws, bs = np.asarray(w_season), np.asarray(b_season)
    wt, bt = np.asarray(w_trend), np.asarray(b_trend)
    s_head = season_proj @ ws                                        # season_pred head
    p_head = s_head + A @ wt                                         # combined pred head
    w_ser = np.concatenate([season_proj, s_head, p_head], axis=1)    # [L, L+2P]
    b_ser = np.concatenate([np.zeros((1, L), np.float32), bs, bs + bt], axis=1)

    # Pack G series per row: value lanes of series g sit at g*2L + 2t + 1.
    G, in_w, out_w, _ = _packing(config)
    w_ser_width = L + 2 * P
    w_bd = np.zeros((in_w, out_w), np.float32)
    m_in = np.zeros((in_w, in_w), np.float32)
    m_out = np.zeros((in_w, out_w), np.float32)
    b_bd = np.zeros((1, out_w), np.float32)
    vmask = np.zeros((1, in_w), np.float32)
    pmask = np.zeros((1, out_w), np.float32)
    for g in range(G):
        i0 = g * 2 * L                       # input-lane offset of group g
        o0 = g * w_ser_width                 # output-lane offset of group g
        val = i0 + 2 * np.arange(L) + 1      # value lanes of group g (ticks at even lanes)
        w_bd[val, o0:o0 + w_ser_width] = w_ser
        m_in[val, i0:i0 + 2 * L] = 1.0 / L
        m_out[val, o0:o0 + w_ser_width] = 1.0 / L
        b_bd[0, o0:o0 + w_ser_width] = b_ser[0]
        vmask[0, val] = 1.0
        pmask[0, o0 + L + P:o0 + w_ser_width] = 1.0

    return {
        # raw (unfolded) params — used only by the pure-JAX reference
        "w_season": w_season, "b_season": b_season,
        "w_trend": w_trend, "b_trend": b_trend, "ma_matrix": jnp.asarray(A),
        # folded + packed constants consumed by the kernel
        "w_bd": jnp.asarray(w_bd), "b_bd": jnp.asarray(b_bd),
        "m_in": jnp.asarray(m_in), "m_out": jnp.asarray(m_out),
        "vmask": jnp.asarray(vmask), "pmask": jnp.asarray(pmask),
    }


# ----------------------------- forward wrapper -------------------------------


def model_forward(params: dict, config: Config, model_inputs, cluster_id=None,
                  out_dtype=jnp.float32):
    """Mirrors Model.forward. Returns (pred, mid_season, mid_season_pred)."""
    del cluster_id  # TODO(synk): embed_cluster path unused (config.embed_cluster=False)
    if model_inputs.ndim == 2:
        model_inputs = model_inputs[None, ...]
    x_raw = model_inputs.astype(jnp.float32)            # [B, L, 2]; ch0=ticks, ch1=values
    B, L, C = x_raw.shape
    P = config.num_pred_step
    assert L == config.num_step and C == 2

    G, in_w, out_w, aligned = _packing(config)
    w_ser_width = L + 2 * P

    # --- batch tiling (packed rows; G series per row) ------------------------
    rows = -(-B // G)
    if rows > _SPLIT_ROWS:
        # >=2 grid steps so v7x's two TensorCores both get work; cap so the
        # per-step buffers (in+out, double buffered) stay ~8 MiB on all gens.
        tb = min(_MAX_TB, _round_up(-(-rows // 2), 8))
    else:
        tb = _round_up(rows, 8)
    n_tiles = -(-rows // tb)
    rows_pad = n_tiles * tb
    b_pad = rows_pad * G
    if b_pad != B:
        x_raw = jnp.pad(x_raw, ((0, b_pad - B), (0, 0), (0, 0)))
    # Free row-major view: no channel-select pass, no transpose.
    x_packed = x_raw.reshape(rows_pad, in_w)

    kernel = functools.partial(_tdlinear_kernel, aligned=aligned)
    resident = lambda shape: pl.BlockSpec(shape, lambda i: (0, 0))

    inputs = [x_packed, params["m_in"]]
    in_specs = [pl.BlockSpec((tb, in_w), lambda i: (i, 0)), resident((in_w, in_w))]
    if not aligned:
        inputs.append(params["m_out"])
        in_specs.append(resident((in_w, out_w)))
    inputs += [params["w_bd"], params["b_bd"], params["vmask"], params["pmask"]]
    in_specs += [resident((in_w, out_w)), resident((1, out_w)),
                 resident((1, in_w)), resident((1, out_w))]

    out = pl.pallas_call(
        kernel,
        out_shape=jax.ShapeDtypeStruct((rows_pad, out_w), out_dtype),
        grid=(n_tiles,),
        in_specs=in_specs,
        out_specs=pl.BlockSpec((tb, out_w), lambda i: (i, 0)),
        compiler_params=pltpu.CompilerParams(
            dimension_semantics=("parallel",),        # megacore shard on v7x
            vmem_limit_bytes=32 * 1024 * 1024),
    )(*inputs)

    # Free view back to per-series rows, then split the slab.
    out = out.reshape(rows_pad * G, w_ser_width)[:B]
    mid_season = out[:, :L]                  # td_linear.mid_season (normalized)
    mid_season_pred = out[:, L:L + P]        # td_linear.mid_season_pred (normalized)
    pred = out[:, L + P:]                    # pred.squeeze(dim=-1) -> [B, P]
    return pred, mid_season, mid_season_pred


# ----------------------------- pure-JAX reference ----------------------------


def _reference_forward(params: dict, config: Config, model_inputs):
    """Unfused reference mirroring the original (unfolded) module math."""
    if model_inputs.ndim == 2:
        model_inputs = model_inputs[None, ...]
    x = model_inputs[..., 1].astype(jnp.float32)
    mean = jnp.mean(x, axis=-1, keepdims=True)
    var = jnp.mean((x - mean) ** 2, axis=-1, keepdims=True)
    std = jnp.sqrt(var + _EPS)
    normed = (x - mean) / std
    trend = normed @ params["ma_matrix"]
    season = normed - trend
    s_pred = season @ params["w_season"] + params["b_season"]
    t_pred = trend @ params["w_trend"] + params["b_trend"]
    pred = (s_pred + t_pred) * std + mean
    return pred, season, s_pred


# ----------------------------- main -----------------------------------------


if __name__ == "__main__":
    config = Config()
    key = jax.random.PRNGKey(0)
    pkey, dkey, dkey2 = jax.random.split(key, 3)

    params = init_params(config, pkey)
    L, P = config.num_step, config.num_pred_step

    def check(batch, data_key, tag):
        ticks = jnp.broadcast_to(jnp.arange(L, dtype=jnp.float32)[None, :], (batch, L))
        values = jax.random.normal(data_key, (batch, L), jnp.float32)
        model_inputs = jnp.stack([ticks, values], axis=-1)        # [B, L, 2]

        fwd = jax.jit(lambda mi: model_forward(params, config, mi))
        pred, mid_season, mid_season_pred = fwd(model_inputs)
        jax.block_until_ready((pred, mid_season, mid_season_pred))

        assert pred.shape == (batch, P)
        assert mid_season.shape == (batch, L)
        assert mid_season_pred.shape == (batch, P)
        assert bool(jnp.all(jnp.isfinite(pred)))

        # MXU f32 matmuls use bf16 passes -> allow a slightly loose tolerance.
        r_pred, r_season, r_spred = _reference_forward(params, config, model_inputs)
        np.testing.assert_allclose(np.asarray(pred), np.asarray(r_pred),
                                   atol=2e-2, rtol=2e-2, err_msg=f"pred[{tag}]")
        np.testing.assert_allclose(np.asarray(mid_season), np.asarray(r_season),
                                   atol=2e-2, rtol=2e-2, err_msg=f"season[{tag}]")
        np.testing.assert_allclose(np.asarray(mid_season_pred), np.asarray(r_spred),
                                   atol=2e-2, rtol=2e-2, err_msg=f"spred[{tag}]")

    check(2, dkey, "small")        # single-tile path (+ G-padding)
    check(1040, dkey2, "tiled")    # multi-tile path (2 grid steps, v7x megacore)

    print("KERNEL_OK")
</pallas_src>

<mosaic_0001>
module attributes {stable_mosaic.version = 11 : i64} {
  func.func @_tdlinear_kernel(%arg0: i32, %arg1: memref<8x128xf32, #tpu.memory_space<vmem>>, %arg2: memref<128x128xf32, #tpu.memory_space<vmem>>, %arg3: memref<128x128xf32, #tpu.memory_space<vmem>>, %arg4: memref<1x128xf32, #tpu.memory_space<vmem>>, %arg5: memref<1x128xf32, #tpu.memory_space<vmem>>, %arg6: memref<1x128xf32, #tpu.memory_space<vmem>>, %arg7: memref<8x128xf32, #tpu.memory_space<vmem>>) attributes {dimension_semantics = [#tpu.dimension_semantics<parallel>], iteration_bounds = array<i64: 1>, scalar_prefetch = 0 : i64, scratch_operands = 0 : i64, tpu.core_type = #tpu.core_type<tc>, window_params = [{transform_indices = @transform_0, window_bounds = array<i64: 8, 128>}, {pipeline_mode = #tpu.pipeline_mode<synchronous>, transform_indices = @transform_1, window_bounds = array<i64: 128, 128>}, {pipeline_mode = #tpu.pipeline_mode<synchronous>, transform_indices = @transform_2, window_bounds = array<i64: 128, 128>}, {pipeline_mode = #tpu.pipeline_mode<synchronous>, transform_indices = @transform_3, window_bounds = array<i64: 1, 128>}, {pipeline_mode = #tpu.pipeline_mode<synchronous>, transform_indices = @transform_4, window_bounds = array<i64: 1, 128>}, {pipeline_mode = #tpu.pipeline_mode<synchronous>, transform_indices = @transform_5, window_bounds = array<i64: 1, 128>}, {transform_indices = @transform_6, window_bounds = array<i64: 8, 128>}]} {
    %c0 = arith.constant 0 : index
    %c0_0 = arith.constant 0 : index
    %0 = vector.load %arg1[%c0, %c0_0] : memref<8x128xf32, #tpu.memory_space<vmem>>, vector<8x128xf32>
    %c0_1 = arith.constant 0 : index
    %c0_2 = arith.constant 0 : index
    %1 = vector.load %arg5[%c0_1, %c0_2] : memref<1x128xf32, #tpu.memory_space<vmem>>, vector<1x128xf32>
    %2 = vector.broadcast %1 : vector<1x128xf32> to vector<8x128xf32>
    %3 = arith.mulf %0, %2 : vector<8x128xf32>
    %c0_3 = arith.constant 0 : index
    %c0_4 = arith.constant 0 : index
    %4 = vector.load %arg2[%c0_3, %c0_4] : memref<128x128xf32, #tpu.memory_space<vmem>>, vector<128x128xf32>
    %cst = arith.constant dense<0.000000e+00> : vector<8x128xf32>
    %5 = tpu.matmul %3, %4, %cst {dimension_numbers = #tpu.dot_dimension_numbers<[1], [0], [0], [1], [0, 0, 1, 1], [], []>} : vector<8x128xf32>, vector<128x128xf32>, vector<8x128xf32> -> vector<8x128xf32>
    %6 = arith.subf %3, %5 : vector<8x128xf32>
    %7 = arith.mulf %6, %6 : vector<8x128xf32>
    %c0_5 = arith.constant 0 : index
    %c0_6 = arith.constant 0 : index
    %8 = vector.load %arg2[%c0_5, %c0_6] : memref<128x128xf32, #tpu.memory_space<vmem>>, vector<128x128xf32>
    %cst_7 = arith.constant dense<0.000000e+00> : vector<8x128xf32>
    %9 = tpu.matmul %7, %8, %cst_7 {dimension_numbers = #tpu.dot_dimension_numbers<[1], [0], [0], [1], [0, 0, 1, 1], [], []>} : vector<8x128xf32>, vector<128x128xf32>, vector<8x128xf32> -> vector<8x128xf32>
    %cst_8 = arith.constant 9.99999974E-6 : f32
    %10 = vector.broadcast %cst_8 : f32 to vector<8x128xf32>
    %11 = arith.addf %9, %10 : vector<8x128xf32>
    %12 = math.rsqrt %11 : vector<8x128xf32>
    %13 = arith.mulf %6, %12 : vector<8x128xf32>
    %c0_9 = arith.constant 0 : index
    %c0_10 = arith.constant 0 : index
    %14 = vector.load %arg3[%c0_9, %c0_10] : memref<128x128xf32, #tpu.memory_space<vmem>>, vector<128x128xf32>
    %cst_11 = arith.constant dense<0.000000e+00> : vector<8x128xf32>
    %15 = tpu.matmul %13, %14, %cst_11 {dimension_numbers = #tpu.dot_dimension_numbers<[1], [0], [0], [1], [0, 0, 1, 1], [], []>} : vector<8x128xf32>, vector<128x128xf32>, vector<8x128xf32> -> vector<8x128xf32>
    %c0_12 = arith.constant 0 : index
    %c0_13 = arith.constant 0 : index
    %16 = vector.load %arg4[%c0_12, %c0_13] : memref<1x128xf32, #tpu.memory_space<vmem>>, vector<1x128xf32>
    %17 = vector.broadcast %16 : vector<1x128xf32> to vector<8x128xf32>
    %18 = arith.addf %15, %17 : vector<8x128xf32>
    %cst_14 = arith.constant 9.99999974E-6 : f32
    %19 = vector.broadcast %cst_14 : f32 to vector<8x128xf32>
    %20 = arith.addf %9, %19 : vector<8x128xf32>
    %21 = arith.mulf %20, %12 : vector<8x128xf32>
    %c0_15 = arith.constant 0 : index
    %c0_16 = arith.constant 0 : index
    %22 = vector.load %arg6[%c0_15, %c0_16] : memref<1x128xf32, #tpu.memory_space<vmem>>, vector<1x128xf32>
    %cst_17 = arith.constant 1.000000e+00 : f32
    %23 = vector.broadcast %cst_17 : f32 to vector<8x128xf32>
    %24 = arith.subf %21, %23 : vector<8x128xf32>
    %25 = vector.broadcast %22 : vector<1x128xf32> to vector<8x128xf32>
    %26 = arith.mulf %24, %25 : vector<8x128xf32>
    %cst_18 = arith.constant 1.000000e+00 : f32
    %27 = vector.broadcast %cst_18 : f32 to vector<8x128xf32>
    %28 = arith.addf %26, %27 : vector<8x128xf32>
    %29 = vector.broadcast %22 : vector<1x128xf32> to vector<8x128xf32>
    %30 = arith.mulf %5, %29 : vector<8x128xf32>
    %31 = arith.mulf %18, %28 : vector<8x128xf32>
    %32 = arith.addf %31, %30 : vector<8x128xf32>
    %c0_19 = arith.constant 0 : index
    %c0_20 = arith.constant 0 : index
    %33 = vector.load %arg7[%c0_19, %c0_20] : memref<8x128xf32, #tpu.memory_space<vmem>>, vector<8x128xf32>
    tpu.vector_store %arg7[%c0_19, %c0_20], %32 {strides = array<i32>} : memref<8x128xf32, #tpu.memory_space<vmem>>, vector<8x128xf32>,
    return
  }
  func.func @transform_0(%arg0: i32) -> (i32, i32) {
    %c0_i32 = arith.constant 0 : i32
    %c0_i32_0 = arith.constant 0 : i32
    return %arg0, %c0_i32 : i32, i32
  }
  func.func @transform_1(%arg0: i32) -> (i32, i32) {
    %c0_i32 = arith.constant 0 : i32
    %c0_i32_0 = arith.constant 0 : i32
    %c0_i32_1 = arith.constant 0 : i32
    return %c0_i32, %c0_i32_0 : i32, i32
  }
  func.func @transform_2(%arg0: i32) -> (i32, i32) {
    %c0_i32 = arith.constant 0 : i32
    %c0_i32_0 = arith.constant 0 : i32
    %c0_i32_1 = arith.constant 0 : i32
    return %c0_i32, %c0_i32_0 : i32, i32
  }
  func.func @transform_3(%arg0: i32) -> (i32, i32) {
    %c0_i32 = arith.constant 0 : i32
    %c0_i32_0 = arith.constant 0 : i32
    %c0_i32_1 = arith.constant 0 : i32
    return %c0_i32, %c0_i32_0 : i32, i32
  }
  func.func @transform_4(%arg0: i32) -> (i32, i32) {
    %c0_i32 = arith.constant 0 : i32
    %c0_i32_0 = arith.constant 0 : i32
    %c0_i32_1 = arith.constant 0 : i32
    return %c0_i32, %c0_i32_0 : i32, i32
  }
  func.func @transform_5(%arg0: i32) -> (i32, i32) {
    %c0_i32 = arith.constant 0 : i32
    %c0_i32_0 = arith.constant 0 : i32
    %c0_i32_1 = arith.constant 0 : i32
    return %c0_i32, %c0_i32_0 : i32, i32
  }
  func.func @transform_6(%arg0: i32) -> (i32, i32) {
    %c0_i32 = arith.constant 0 : i32
    %c0_i32_0 = arith.constant 0 : i32
    return %arg0, %c0_i32 : i32, i32
  }
}

</mosaic_0001>

<bundles_post_ra>
// kernel: _lambda_.1
= control target key start
LH: loop header
LB: loop body
LE: loop exit
PB: predicated region body
PF: predicated region fallthrough
CT: control target
= control target key end

     0   :  { %v541_v0 = vmov 0.0|0.0   ;;  %vm542_vm0 = vmmov 0   ;;  %v543_v4 = vmov 0.0   ;;  %s717_s1 = inlined_call_operand.vmem [shape: f32[128,128], index: 1, kind: input, shape index: {}]   ;;  %s718_s0 = inlined_call_operand.vmem [shape: f32[8,128], index: 0, kind: input, shape index: {}]   ;;  %s719_s4 = inlined_call_operand.vmem [shape: f32[1,128], index: 4, kind: input, shape index: {}]   ;;  %s720_s2 = inlined_call_operand.vmem [shape: f32[128,128], index: 2, kind: input, shape index: {}]   ;;  %s721_s5 = inlined_call_operand.vmem [shape: f32[1,128], index: 5, kind: input, shape index: {}]   ;;  %s722_s3 = inlined_call_operand.vmem [shape: f32[1,128], index: 3, kind: input, shape index: {}]   ;;  %s723_s6 = inlined_call_operand.vmem [shape: f32[8,128], index: 6, kind: output, shape index: {}]  }
   0x1   :  { %464 = vmatprep.subr.bf16.mxu0 %v541_v0  ;;  %v32_v1 = vld [vmem:[%s717_s1] sm:$0xff]  ;;  %v33_v2 = vld [vmem:[%s717_s1 + $0x8] sm:$0xff]  ;;  %v34_v3 = vld [vmem:[%s717_s1 + $0x10] sm:$0xff]  ;;  %391 = vmatprep.mubr.msk.f32.mxu0 %vm542_vm0, %v543_v4 }
   0x2   :  { %v465_v5 = vpack.c.bf16 %v33_v2, %v32_v1  ;;  %v35_v6 = vld [vmem:[%s717_s1 + $0x18] sm:$0xff]  ;;  %488 = vmatprep.subr.bf16.mxu1 %v541_v0  ;;  %426 = vmatprep.mubr.msk.f32.mxu1 %vm542_vm0, %v543_v4  ;;  %v36_v8 = vld [vmem:[%s717_s1 + $0x20] sm:$0xff]  ;;  %v37_v9 = vld [vmem:[%s717_s1 + $0x28] sm:$0xff] }
   0x3   :  { %v468_v7 = vpack.c.bf16 %v35_v6, %v34_v3  ;;  %v471_v10 = vpack.c.bf16 %v37_v9, %v36_v8  ;;  %v38_v11 = vld [vmem:[%s717_s1 + $0x30] sm:$0xff]  ;;  %v39_v12 = vld [vmem:[%s717_s1 + $0x38] sm:$0xff]  ;;  %v40_v14 = vld [vmem:[%s717_s1 + $0x40] sm:$0xff] }
   0x4   :  { %466 = vmatpush3.bf16.msra.mxu0 %v465_v5  ;;  %490 = vmatpush3.bf16.msra.mxu1 %v465_v5  ;;  %v474_v13 = vpack.c.bf16 %v39_v12, %v38_v11  ;;  %v41_v15 = vld [vmem:[%s717_s1 + $0x48] sm:$0xff]  ;;  %v42_v17 = vld [vmem:[%s717_s1 + $0x50] sm:$0xff]  ;;  %v43_v18 = vld [vmem:[%s717_s1 + $0x58] sm:$0xff] }
   0x5   :  { %467 = vmatprep.subr.bf16.mxu0 %v541_v0  ;;  %491 = vmatprep.subr.bf16.mxu1 %v541_v0  ;;  %v477_v16 = vpack.c.bf16 %v41_v15, %v40_v14  ;;  %v480_v19 = vpack.c.bf16 %v43_v18, %v42_v17  ;;  %v44_v20 = vld [vmem:[%s717_s1 + $0x60] sm:$0xff]  ;;  %v45_v21 = vld [vmem:[%s717_s1 + $0x68] sm:$0xff]  ;;  %v46_v23 = vld [vmem:[%s717_s1 + $0x70] sm:$0xff] }
   0x6   :  { %v483_v22 = vpack.c.bf16 %v45_v21, %v44_v20  ;;  %v47_v24 = vld [vmem:[%s717_s1 + $0x78] sm:$0xff]  ;;  %v23_v26 = vld [vmem:[%s718_s0] sm:$0xff]  ;;  %v193_v30 = vld [vmem:[%s720_s2 + $0x8] sm:$0xff] }
   0x7   :  { %v486_v25 = vpack.c.bf16 %v47_v24, %v46_v23  ;;  %v304_v27 = vld [vmem:[%s719_s4] ss:$0 sm:$0xff]  ;;  %v194_v31 = vld [vmem:[%s720_s2 + $0x10] sm:$0xff]  ;;  %v195_v33 = vld [vmem:[%s720_s2 + $0x18] sm:$0xff] }
   0x8   :  { %469 = vmatpush3.bf16.msra.mxu0 %v468_v7  ;;  %493 = vmatpush3.bf16.msra.mxu1 %v468_v7  ;;  %v31_v28 = vmul.f32 %v304_v27, %v23_v26  ;;  %v192_v29 = vld [vmem:[%s720_s2] sm:$0xff]  ;;  %v516_v34 = vpack.c.bf16 %v195_v33, %v194_v31  ;;  %v197_v36 = vld [vmem:[%s720_s2 + $0x28] sm:$0xff]  ;;  %v198_v38 = vld [vmem:[%s720_s2 + $0x30] sm:$0xff] }
   0x9   :  { %470 = vmatprep.subr.bf16.mxu0 %v541_v0  ;;  %494 = vmatprep.subr.bf16.mxu1 %v541_v0  ;;  %v513_v32 = vpack.c.bf16 %v193_v30, %v192_v29  ;;  %v196_v35 = vld [vmem:[%s720_s2 + $0x20] sm:$0xff]  ;;  %v199_v39 = vld [vmem:[%s720_s2 + $0x38] sm:$0xff]  ;;  %v201_v46 = vld [vmem:[%s720_s2 + $0x48] sm:$0xff] }
   0xa   :  { %v519_v37 = vpack.c.bf16 %v197_v36, %v196_v35  ;;  %v522_v40 = vpack.c.bf16 %v199_v39, %v198_v38  ;;  %v200_v45 = vld [vmem:[%s720_s2 + $0x40] sm:$0xff]  ;;  %v202_v48 = vld [vmem:[%s720_s2 + $0x50] sm:$0xff]  ;;  %v203_v49 = vld [vmem:[%s720_s2 + $0x58] sm:$0xff] }
   0xb   :  { %v525_v47 = vpack.c.bf16 %v201_v46, %v200_v45  ;;  %v528_v50 = vpack.c.bf16 %v203_v49, %v202_v48  ;;  %v204_v51 = vld [vmem:[%s720_s2 + $0x60] sm:$0xff]  ;;  %v205_v52 = vld [vmem:[%s720_s2 + $0x68] sm:$0xff]  ;;  %v206_v54 = vld [vmem:[%s720_s2 + $0x70] sm:$0xff] }
   0xc   :  { %472 = vmatpush3.bf16.msra.mxu0 %v471_v10  ;;  %496 = vmatpush3.bf16.msra.mxu1 %v471_v10  ;;  %v531_v53 = vpack.c.bf16 %v205_v52, %v204_v51  ;;  %v207_v55 = vld [vmem:[%s720_s2 + $0x78] sm:$0xff]  ;;  %v305_v2 = vld [vmem:[%s722_s3] ss:$0 sm:$0xff] }
   0xd   :  { %473 = vmatprep.subr.bf16.mxu0 %v541_v0  ;;  %497 = vmatprep.subr.bf16.mxu1 %v541_v0  ;;  %v534_v56 = vpack.c.bf16 %v207_v55, %v206_v54 }
  0x10   :  { %475 = vmatpush3.bf16.msra.mxu0 %v474_v13  ;;  %499 = vmatpush3.bf16.msra.mxu1 %v474_v13 }
  0x11   :  { %476 = vmatprep.subr.bf16.mxu0 %v541_v0  ;;  %500 = vmatprep.subr.bf16.mxu1 %v541_v0 }
  0x14   :  { %478 = vmatpush3.bf16.msra.mxu0 %v477_v16  ;;  %502 = vmatpush3.bf16.msra.mxu1 %v477_v16 }
  0x15   :  { %479 = vmatprep.subr.bf16.mxu0 %v541_v0  ;;  %503 = vmatprep.subr.bf16.mxu1 %v541_v0 }
  0x18   :  { %481 = vmatpush3.bf16.msra.mxu0 %v480_v19  ;;  %505 = vmatpush3.bf16.msra.mxu1 %v480_v19 }
  0x19   :  { %482 = vmatprep.subr.bf16.mxu0 %v541_v0  ;;  %506 = vmatprep.subr.bf16.mxu1 %v541_v0 }
  0x1c   :  { %484 = vmatpush3.bf16.msra.mxu0 %v483_v22  ;;  %508 = vmatpush3.bf16.msra.mxu1 %v483_v22 }
  0x1d   :  { %485 = vmatprep.subr.bf16.mxu0 %v541_v0  ;;  %509 = vmatprep.subr.bf16.mxu1 %v541_v0 }
  0x20   :  { %487 = vmatpush3.bf16.msra.mxu0 %v486_v25  ;;  %511 = vmatpush3.bf16.msra.mxu1 %v486_v25 }
  0x21   :  { %512 = vmatprep.subr.bf16.mxu0 %v541_v0 }
  0x23   :  { %392 = vmatmul.mubr.f32.vlgmr.msra.gmra.mrb[0].mxu0 %v31_v28 }
  0x24   :  { %461 = vmatprep.mubr.msk.f32.mxu0 %vm542_vm0, %v543_v4  ;;  %514 = vmatpush3.bf16.msra.mxu0 %v513_v32 }
  0x25   :  { %515 = vmatprep.subr.bf16.mxu0 %v541_v0 }
  0x28   :  { %517 = vmatpush3.bf16.msra.mxu0 %v516_v34 }
  0x29   :  { %518 = vmatprep.subr.bf16.mxu0 %v541_v0 }
  0x2c   :  { %520 = vmatpush3.bf16.msra.mxu0 %v519_v37 }
  0x2d   :  { %521 = vmatprep.subr.bf16.mxu0 %v541_v0 }
  0x30   :  { %523 = vmatpush3.bf16.msra.mxu0 %v522_v40 }
  0x31   :  { %524 = vmatprep.subr.bf16.mxu0 %v541_v0 }
  0x34   :  { %526 = vmatpush3.bf16.msra.mxu0 %v525_v47 }
  0x35   :  { %527 = vmatprep.subr.bf16.mxu0 %v541_v0 }
  0x38   :  { %529 = vmatpush3.bf16.msra.mxu0 %v528_v50 }
  0x39   :  { %530 = vmatprep.subr.bf16.mxu0 %v541_v0 }
  0x3c   :  { %532 = vmatpush3.bf16.msra.mxu0 %v531_v53 }
  0x3d   :  { %533 = vmatprep.subr.bf16.mxu0 %v541_v0  ;;  %v307_v0 = vld [vmem:[%s721_s5] ss:$0 sm:$0xff] }
  0x40   :  { %535 = vmatpush3.bf16.msra.mxu0 %v534_v56 }
  0xf6   :  { %v114_v41 = vpop.f32.mrb[0].mxu0 }
  0xf7   :  { %v118_v42 = vsub.f32 %v31_v28, %v114_v41  ;;  %v393_v43 = vpop.f32.mrb[1].mxu0  ;;  %v296_v7 = vmul.f32 %v307_v0, %v114_v41 }
  0xf9   :  { %v119_v44 = vmul.f32 %v118_v42, %v118_v42 }
  0xfb   :  { %427 = vmatmul.mubr.f32.vlgmr.msra.gmra.mrb[0].mxu1 %v119_v44 }
 0x1ce   :  { %v186_v57 = vpop.f32.mrb[0].mxu1 }
 0x1cf   :  { %v187_v58 = vadd.f32 1e-05, %v186_v57  ;;  %v428_v59 = vpop.f32.mrb[1].mxu1 }
 0x1d1   :  { %539 = vrsqrt.f32 %v187_v58 }
 0x1db   :  { %v540_v60 = vpop.eup %539 }
 0x1dc   :  { %v285_v61 = vmul.f32 %v540_v60, %v187_v58  ;;  %v191_v62 = vmul.f32 %v540_v60, %v118_v42 }
 0x1de   :  { %462 = vmatmul.mubr.f32.vlgmr.msra.gmra.mrb[2].mxu0 %v191_v62  ;;  %v306_v63 = vadd.f32 -1.0, %v285_v61 }
 0x1e0   :  { %v294_v1 = vmul.f32 %v307_v0, %v306_v63 }
 0x1e2   :  { %v295_v5 = vadd.f32 1.0, %v294_v1 }
 0x2b1   :  { %v281_v3 = vpop.f32.mrb[2].mxu0 }
 0x2b2   :  { %v282_v4 = vadd.f32 %v305_v2, %v281_v3  ;;  %v463_v6 = vpop.f32.mrb[3].mxu0 }
 0x2b4   :  { %v297_v8 = vmul.f32 %v295_v5, %v282_v4 }
 0x2b6   :  { %v298_v9 = vadd.f32 %v297_v8, %v296_v7 }
 0x2b8   :  { %299 = vst [vmem:[%s723_s6] sm:$0xff] %v298_v9 }

</bundles_post_ra>
